<compile_context>
chip_gen: v6e
topology: v6e:2x2x1
jax: 0.10.0
libtpu: 0.0.40
codegen_flags: <defaults>
</compile_context>

<pallas_src>
import jax
import jax.numpy as jnp
from jax.experimental import pallas as pl
from jax.experimental.pallas import tpu as pltpu


def _round_up(x, m):
    return (x + m - 1) // m * m


def _largest_divisor_tile(dim, candidates):
    for c in candidates:
        if c <= dim and dim % c == 0:
            return c
    return dim  # only hit for tiny/awkward dims; callers guarantee 8/128 multiples


# ---------------------------------------------------------------------------
# Kernel A: generic tiled matmul + bias   out = x @ w + b   (bf16 in, f32 acc)
# Used for (1) the hoisted input-to-hidden GEMM and (3) the vocab projection.
# ---------------------------------------------------------------------------
def _matmul_bias_kernel(x_ref, w_ref, b_ref, o_ref, acc_ref):
    k = pl.program_id(2)

    @pl.when(k == 0)
    def _():
        acc_ref[...] = jnp.zeros_like(acc_ref)

    acc_ref[...] += jnp.dot(x_ref[...], w_ref[...],
                            preferred_element_type=jnp.float32)

    @pl.when(k == pl.num_programs(2) - 1)
    def _():
        o_ref[...] = (acc_ref[...] + b_ref[...]).astype(o_ref.dtype)


def matmul_bias(x, w, b, out_dtype=jnp.float32, prefer_large_m=False):
    """x: (M, K) bf16, w: (K, N) bf16, b: (1, N) f32 -> (M, N) out_dtype."""
    M, K = x.shape
    K2, N = w.shape
    assert K == K2 and b.shape == (1, N)
    assert M % 8 == 0 and K % 128 == 0 and N % 128 == 0, (M, K, N)

    if prefer_large_m:
        # Projection path: keep the (small) activation tile resident across the
        # vocab-column loop so the big (K, N) weight streams from HBM ~once.
        tm = _largest_divisor_tile(M, (1024, 512, 256, 128, 64, 32, 16, 8))
        tn = _largest_divisor_tile(N, (512, 256, 128))
        tk = K if K <= 2048 else _largest_divisor_tile(K, (1024, 512, 256, 128))
    else:
        tm = _largest_divisor_tile(M, (256, 128, 64, 32, 16, 8))
        tn = _largest_divisor_tile(N, (256, 128))
        tk = _largest_divisor_tile(K, (512, 256, 128))

    out_bytes = jnp.dtype(out_dtype).itemsize
    vmem_need = (2 * tm * tk * 2 + 2 * tk * tn * 2          # double-buffered bf16 inputs
                 + 2 * tm * tn * out_bytes                  # double-buffered output
                 + tm * tn * 4 + 2 * tn * 4)                # f32 acc + bias
    vmem_limit = int(min(max(2 * vmem_need, 16 << 20), 60 << 20))

    grid = (M // tm, N // tn, K // tk)
    return pl.pallas_call(
        _matmul_bias_kernel,
        out_shape=jax.ShapeDtypeStruct((M, N), out_dtype),
        grid_spec=pltpu.PrefetchScalarGridSpec(
            num_scalar_prefetch=0,
            grid=grid,
            in_specs=[
                pl.BlockSpec((tm, tk), lambda i, j, k: (i, k)),
                pl.BlockSpec((tk, tn), lambda i, j, k: (k, j)),
                pl.BlockSpec((1, tn), lambda i, j, k: (0, j)),
            ],
            out_specs=pl.BlockSpec((tm, tn), lambda i, j, k: (i, j)),
            scratch_shapes=[pltpu.VMEM((tm, tn), jnp.float32)],
        ),
        compiler_params=pltpu.CompilerParams(
            dimension_semantics=("parallel", "parallel", "arbitrary"),
            vmem_limit_bytes=vmem_limit,
        ),
    )(x, w, b)


# ---------------------------------------------------------------------------
# Kernel B: the LSTM recurrence.
# Grid = (batch_blocks [parallel], time_blocks [arbitrary]); per step only
# h @ W_hh^T (bf16 MXU) + f32 gate math.  h carried in bf16, c in f32 (VMEM
# scratch).  W_hh^T is DMA'd once per batch block into a single resident VMEM
# buffer.  Output is written batch-major (Bp, Tp, Hp) in bf16.
# ---------------------------------------------------------------------------
def _lstm_recurrent_kernel(gx_ref, whh_hbm_ref, h_out_ref,
                           whh_vmem, copy_sem, h_sc, c_sc):
    t_blk = pl.program_id(1)

    @pl.when(t_blk == 0)
    def _():
        cp = pltpu.make_async_copy(whh_hbm_ref, whh_vmem, copy_sem)
        cp.start()
        h_sc[...] = jnp.zeros_like(h_sc)   # bf16 h carry
        c_sc[...] = jnp.zeros_like(c_sc)   # f32 c carry
        cp.wait()

    block_t = gx_ref.shape[0]
    Hp = h_sc.shape[-1]

    h = h_sc[...]          # (bb, Hp) bf16
    c = c_sc[...]          # (bb, Hp) f32
    for i in range(block_t):   # static, small (<=16) -> fully visible to scheduler
        # gates = (x_t @ W_ih^T + b) [precomputed, bf16] + h @ W_hh^T (f32 acc)
        gates = gx_ref[i].astype(jnp.float32) + jnp.dot(
            h, whh_vmem[...], preferred_element_type=jnp.float32)
        # PyTorch gate order: i, f, g, o.  Hp multiple of 128 -> aligned views.
        i_g = jax.nn.sigmoid(gates[:, 0 * Hp:1 * Hp])
        f_g = jax.nn.sigmoid(gates[:, 1 * Hp:2 * Hp])
        g_g = jnp.tanh(gates[:, 2 * Hp:3 * Hp])
        o_g = jax.nn.sigmoid(gates[:, 3 * Hp:4 * Hp])
        c = f_g * c + i_g * g_g                       # f32 state update (VPU/EUP)
        h = (o_g * jnp.tanh(c)).astype(jnp.bfloat16)  # single cast; reused for store+matmul
        h_out_ref[:, i, :] = h                        # batch-major block store
    h_sc[...] = h
    c_sc[...] = c


def lstm_recurrence(gx, w_hh_t, block_t):
    """gx: (Tp, Bp, 4Hp) bf16 pre-gates, w_hh_t: (Hp, 4Hp) bf16
       -> hiddens (Bp, Tp, Hp) bf16 (batch-major)."""
    Tp, Bp, G = gx.shape
    Hp, G2 = w_hh_t.shape
    assert G == G2 == 4 * Hp and Tp % block_t == 0 and Bp % 8 == 0

    # Up to 2 batch blocks so v7x's two TensorCores can each take one (harmless
    # elsewhere: one extra W_hh copy + a few extra grid steps).
    bb = Bp // 2 if (Bp % 16 == 0) else Bp
    nb, nt = Bp // bb, Tp // block_t

    vmem_need = (Hp * 4 * Hp * 2                     # resident W_hh^T (bf16)
                 + 2 * block_t * bb * 4 * Hp * 2     # double-buffered gx block (bf16)
                 + 2 * bb * block_t * Hp * 2         # double-buffered out block (bf16)
                 + bb * Hp * (2 + 4))                # h (bf16) + c (f32) carries
    # TODO(synk): for very large H (W_hh residency > ~32 MiB, v7x 64 MiB VMEM),
    # tile W_hh along the gate axis inside the step loop instead of asserting.
    assert vmem_need < 56 * 1024 * 1024, vmem_need
    vmem_limit = int(min(max(2 * vmem_need, 16 << 20), 60 << 20))

    return pl.pallas_call(
        _lstm_recurrent_kernel,
        out_shape=jax.ShapeDtypeStruct((Bp, Tp, Hp), jnp.bfloat16),
        grid_spec=pltpu.PrefetchScalarGridSpec(
            num_scalar_prefetch=0,
            grid=(nb, nt),
            in_specs=[
                pl.BlockSpec((block_t, bb, G), lambda b, t: (t, b, 0)),  # pre-gates block
                pl.BlockSpec(memory_space=pl.ANY),                        # W_hh^T: raw HBM ref
            ],
            out_specs=pl.BlockSpec((bb, block_t, Hp), lambda b, t: (b, t, 0)),
            scratch_shapes=[
                pltpu.VMEM((Hp, 4 * Hp), jnp.bfloat16),  # single resident copy of W_hh^T
                pltpu.SemaphoreType.DMA,                 # its copy semaphore
                pltpu.VMEM((bb, Hp), jnp.bfloat16),      # h carry (bf16)
                pltpu.VMEM((bb, Hp), jnp.float32),       # c carry (f32)
            ],
        ),
        compiler_params=pltpu.CompilerParams(
            dimension_semantics=("parallel", "arbitrary"),  # batch parallel, time sequential
            vmem_limit_bytes=vmem_limit,
        ),
    )(gx, w_hh_t)


# ---------------------------------------------------------------------------
# Parameters + padding glue
# ---------------------------------------------------------------------------
class DecoderRNNParams:
    """Deterministic synthetic parameters matching the PyTorch module shapes."""

    def __init__(self, embed_size, hidden_size, vocab_size, key):
        self.embed_size = embed_size
        self.hidden_size = hidden_size
        self.vocab_size = vocab_size
        ks = jax.random.split(key, 7)
        s = 0.1
        self.embed = s * jax.random.normal(ks[0], (vocab_size, embed_size), jnp.float32)
        # nn.LSTM layer 0: weight_ih (4H,E), weight_hh (4H,H), bias_ih (4H,), bias_hh (4H,)
        self.w_ih = s * jax.random.normal(ks[1], (4 * hidden_size, embed_size), jnp.float32)
        self.w_hh = s * jax.random.normal(ks[2], (4 * hidden_size, hidden_size), jnp.float32)
        self.b_ih = s * jax.random.normal(ks[3], (4 * hidden_size,), jnp.float32)
        self.b_hh = s * jax.random.normal(ks[4], (4 * hidden_size,), jnp.float32)
        # nn.Linear: weight (V,H), bias (V,)
        self.w_lin = s * jax.random.normal(ks[5], (vocab_size, hidden_size), jnp.float32)
        self.b_lin = s * jax.random.normal(ks[6], (vocab_size,), jnp.float32)


def _pad_gate_weight(w, H, Hp, d_in, d_in_p):
    """PyTorch gate-stacked (4H, d_in) weight -> transposed, zero-padded (d_in_p, 4*Hp) bf16.

    Each of the 4 gate blocks is padded H -> Hp separately so in-kernel gate slices
    at multiples of Hp stay aligned. Zero padding keeps padded gate columns inert
    (i=f=o=sigmoid(0)=0.5, g=tanh(0)=0 -> c,h stay 0 in padded columns)."""
    out = jnp.zeros((d_in_p, 4 * Hp), jnp.float32)
    for g in range(4):
        out = out.at[:d_in, g * Hp:g * Hp + H].set(w[g * H:(g + 1) * H, :].T)
    return out.astype(jnp.bfloat16)


def _pad_gate_bias(b, H, Hp):
    out = jnp.zeros((1, 4 * Hp), jnp.float32)
    for g in range(4):
        out = out.at[0, g * Hp:g * Hp + H].set(b[g * H:(g + 1) * H])
    return out


def decoder_rnn_forward(params, features, captions):
    """
    features: (B, E) float32, captions: (B, L) int32  ->  (B, L, V) float32
    Same semantics as the PyTorch DecoderRNN.forward.
    """
    B, E = features.shape
    L = captions.shape[1]
    H, V = params.hidden_size, params.vocab_size
    T = L

    # --- pad to TPU-friendly sizes: lanes=128, sublanes=8, time to mult. of 8 ---
    Bp = _round_up(B, 8)
    Ep = _round_up(E, 128)
    Hp = _round_up(H, 128)
    Vp = _round_up(V, 128)
    Tp = _round_up(T, 8)
    block_t = 16 if Tp % 16 == 0 else 8   # large time blocks; always legal for (8,128)

    # --- glue: embedding lookup (bf16) + prepend image feature (plain JAX gather) ---
    # TODO(synk): embedding gather left to XLA (no clean rectangular-tile Pallas form).
    emb = jnp.take(params.embed.astype(jnp.bfloat16), captions[:, :-1], axis=0)   # (B, L-1, E)
    x = jnp.concatenate([features.astype(jnp.bfloat16)[:, None, :], emb], axis=1)  # (B, T, E) bf16

    # time-major padded input slab, built directly in bf16 (no separate convert pass)
    x_p = jnp.zeros((Tp, Bp, Ep), jnp.bfloat16)
    x_p = x_p.at[:T, :B, :E].set(jnp.transpose(x, (1, 0, 2)))

    w_ih_p = _pad_gate_weight(params.w_ih, H, Hp, E, Ep)          # (Ep, 4Hp) bf16
    w_hh_p = _pad_gate_weight(params.w_hh, H, Hp, H, Hp)          # (Hp, 4Hp) bf16
    bias_p = _pad_gate_bias(params.b_ih + params.b_hh, H, Hp)     # (1, 4Hp)  f32
    w_lin_p = jnp.zeros((Hp, Vp), jnp.float32).at[:H, :V].set(
        params.w_lin.T).astype(jnp.bfloat16)                      # (Hp, Vp)  bf16
    b_lin_p = jnp.zeros((1, Vp), jnp.float32).at[0, :V].set(params.b_lin)

    # (1) hoisted input-to-hidden GEMM over all Tp*Bp rows; pre-gates stored in bf16
    gx = matmul_bias(x_p.reshape(Tp * Bp, Ep), w_ih_p, bias_p,
                     out_dtype=jnp.bfloat16)
    gx = gx.reshape(Tp, Bp, 4 * Hp)                               # (Tp, Bp, 4Hp) bf16

    # (2) sequential recurrence; emits batch-major bf16 hiddens directly
    h_all = lstm_recurrence(gx, w_hh_p, block_t)                  # (Bp, Tp, Hp) bf16

    # (3) hoisted output projection over all Bp*Tp rows (batch-major -> no logits transpose)
    logits = matmul_bias(h_all.reshape(Bp * Tp, Hp), w_lin_p, b_lin_p,
                         out_dtype=jnp.float32, prefer_large_m=True)
    logits = logits.reshape(Bp, Tp, Vp)[:B, :T, :V]               # strip padding
    return logits                                                 # (B, T, V)
    # TODO(synk): self.dropout is declared in __init__ but never applied in forward(); omitted.


# ---------------------------------------------------------------------------
# Pure-JAX f32 reference of the same recurrence for a sanity check.
# ---------------------------------------------------------------------------
def ref_forward(params, features, captions):
    B, _ = features.shape
    L = captions.shape[1]
    H = params.hidden_size
    emb = jnp.take(params.embed, captions[:, :-1], axis=0)
    x = jnp.concatenate([features[:, None, :], emb], axis=1)
    h = jnp.zeros((B, H), jnp.float32)
    c = jnp.zeros((B, H), jnp.float32)
    outs = []
    for t in range(L):
        g = x[:, t] @ params.w_ih.T + h @ params.w_hh.T + params.b_ih + params.b_hh
        i = jax.nn.sigmoid(g[:, 0 * H:1 * H])
        f = jax.nn.sigmoid(g[:, 1 * H:2 * H])
        gg = jnp.tanh(g[:, 2 * H:3 * H])
        o = jax.nn.sigmoid(g[:, 3 * H:4 * H])
        c = f * c + i * gg
        h = o * jnp.tanh(c)
        outs.append(h @ params.w_lin.T + params.b_lin)
    return jnp.stack(outs, axis=1)


if __name__ == "__main__":
    B, E, H, V, L = 2, 32, 32, 16, 8   # batch, embed, hidden, vocab, max_seq_len

    key = jax.random.PRNGKey(0)
    k_par, k_feat, k_cap = jax.random.split(key, 3)

    params = DecoderRNNParams(E, H, V, k_par)
    features = jax.random.normal(k_feat, (B, E), jnp.float32)
    captions = jax.random.randint(k_cap, (B, L), 0, V, jnp.int32)

    out = decoder_rnn_forward(params, features, captions)
    out = jax.block_until_ready(out)
    assert out.shape == (B, L, V), out.shape

    ref = ref_forward(params, features, captions)
    err = float(jnp.max(jnp.abs(out - ref)))
    # Matmul operands and the gx / h_all intermediates are bf16 (f32 MXU accumulation,
    # f32 gate/cell math), so compare against the f32 reference with a looser tolerance.
    assert err < 2e-2, err

    print("KERNEL_OK")
</pallas_src>

<mosaic_0001>
module attributes {stable_mosaic.version = 11 : i64} {
  func.func @_matmul_bias_kernel(%arg0: i32, %arg1: i32, %arg2: i32, %arg3: memref<64x128xbf16, #tpu.memory_space<vmem>>, %arg4: memref<128x256xbf16, #tpu.memory_space<vmem>>, %arg5: memref<1x256xf32, #tpu.memory_space<vmem>>, %arg6: memref<64x256xbf16, #tpu.memory_space<vmem>>, %arg7: memref<64x256xf32, #tpu.memory_space<vmem>>) attributes {dimension_semantics = [#tpu.dimension_semantics<parallel>, #tpu.dimension_semantics<parallel>, #tpu.dimension_semantics<arbitrary>], iteration_bounds = array<i64: 1, 2, 1>, scalar_prefetch = 0 : i64, scratch_operands = 1 : i64, tpu.core_type = #tpu.core_type<tc>, window_params = [{transform_indices = @transform_0, window_bounds = array<i64: 64, 128>}, {transform_indices = @transform_1, window_bounds = array<i64: 128, 256>}, {transform_indices = @transform_2, window_bounds = array<i64: 1, 256>}, {transform_indices = @transform_3, window_bounds = array<i64: 64, 256>}]} {
    %c0_i32 = arith.constant 0 : i32
    %0 = arith.cmpi eq, %arg2, %c0_i32 : i32
    %1 = arith.extui %0 : i1 to i32
    %c0_i32_0 = arith.constant 0 : i32
    %2 = arith.cmpi ne, %1, %c0_i32_0 : i32
    scf.if %2 {
      %cst_10 = arith.constant 0.000000e+00 : f32
      %12 = vector.broadcast %cst_10 : f32 to vector<64x256xf32>
      %c0_11 = arith.constant 0 : index
      %c0_12 = arith.constant 0 : index
      %13 = vector.load %arg7[%c0_11, %c0_12] : memref<64x256xf32, #tpu.memory_space<vmem>>, vector<64x256xf32>
      tpu.vector_store %arg7[%c0_11, %c0_12], %12 {strides = array<i32>} : memref<64x256xf32, #tpu.memory_space<vmem>>, vector<64x256xf32>,
    } else {
    }
    %c0 = arith.constant 0 : index
    %c0_1 = arith.constant 0 : index
    %3 = vector.load %arg7[%c0, %c0_1] : memref<64x256xf32, #tpu.memory_space<vmem>>, vector<64x256xf32>
    %c0_2 = arith.constant 0 : index
    %c0_3 = arith.constant 0 : index
    %4 = vector.load %arg3[%c0_2, %c0_3] : memref<64x128xbf16, #tpu.memory_space<vmem>>, vector<64x128xbf16>
    %c0_4 = arith.constant 0 : index
    %c0_5 = arith.constant 0 : index
    %5 = vector.load %arg4[%c0_4, %c0_5] : memref<128x256xbf16, #tpu.memory_space<vmem>>, vector<128x256xbf16>
    %cst = arith.constant dense<0.000000e+00> : vector<64x256xf32>
    %6 = tpu.matmul %4, %5, %cst {dimension_numbers = #tpu.dot_dimension_numbers<[1], [0], [0], [1], [0, 0, 1, 1], [], []>} : vector<64x128xbf16>, vector<128x256xbf16>, vector<64x256xf32> -> vector<64x256xf32>
    %7 = arith.addf %3, %6 : vector<64x256xf32>
    %c0_6 = arith.constant 0 : index
    %c0_7 = arith.constant 0 : index
    %8 = vector.load %arg7[%c0_6, %c0_7] : memref<64x256xf32, #tpu.memory_space<vmem>>, vector<64x256xf32>
    tpu.vector_store %arg7[%c0_6, %c0_7], %7 {strides = array<i32>} : memref<64x256xf32, #tpu.memory_space<vmem>>, vector<64x256xf32>,
    %c0_i32_8 = arith.constant 0 : i32
    %9 = arith.cmpi eq, %arg2, %c0_i32_8 : i32
    %10 = arith.extui %9 : i1 to i32
    %c0_i32_9 = arith.constant 0 : i32
    %11 = arith.cmpi ne, %10, %c0_i32_9 : i32
    scf.if %11 {
      %c0_10 = arith.constant 0 : index
      %c0_11 = arith.constant 0 : index
      %12 = vector.load %arg7[%c0_10, %c0_11] : memref<64x256xf32, #tpu.memory_space<vmem>>, vector<64x256xf32>
      %c0_12 = arith.constant 0 : index
      %c0_13 = arith.constant 0 : index
      %13 = vector.load %arg5[%c0_12, %c0_13] : memref<1x256xf32, #tpu.memory_space<vmem>>, vector<1x256xf32>
      %14 = vector.broadcast %13 : vector<1x256xf32> to vector<64x256xf32>
      %15 = arith.addf %12, %14 : vector<64x256xf32>
      %16 = arith.truncf %15 : vector<64x256xf32> to vector<64x256xbf16>
      %c0_14 = arith.constant 0 : index
      %c0_15 = arith.constant 0 : index
      %17 = vector.load %arg6[%c0_14, %c0_15] : memref<64x256xbf16, #tpu.memory_space<vmem>>, vector<64x256xbf16>
      tpu.vector_store %arg6[%c0_14, %c0_15], %16 {strides = array<i32>} : memref<64x256xbf16, #tpu.memory_space<vmem>>, vector<64x256xbf16>,
    } else {
    }
    return
  }
  func.func @transform_0(%arg0: i32, %arg1: i32, %arg2: i32) -> (i32, i32) {
    %c0_i32 = arith.constant 0 : i32
    return %arg0, %arg2 : i32, i32
  }
  func.func @transform_1(%arg0: i32, %arg1: i32, %arg2: i32) -> (i32, i32) {
    %c0_i32 = arith.constant 0 : i32
    return %arg2, %arg1 : i32, i32
  }
  func.func @transform_2(%arg0: i32, %arg1: i32, %arg2: i32) -> (i32, i32) {
    %c0_i32 = arith.constant 0 : i32
    %c0_i32_0 = arith.constant 0 : i32
    return %c0_i32, %arg1 : i32, i32
  }
  func.func @transform_3(%arg0: i32, %arg1: i32, %arg2: i32) -> (i32, i32) {
    %c0_i32 = arith.constant 0 : i32
    return %arg0, %arg1 : i32, i32
  }
}

</mosaic_0001>

<bundles_post_ra>
// kernel: tpu_custom_call.1
= control target key start
LH: loop header
LB: loop body
LE: loop exit
PB: predicated region body
PF: predicated region fallthrough
CT: control target
= control target key end

     0   :  { %8 = vsyncpa [#allocation4], 0  ;;  %s1420_s0 = inlined_call_operand.hbm [shape: bf16[64,128], index: 0, kind: input, shape index: {}]   ;;  %s1421_s1 = inlined_call_operand.hbm [shape: bf16[128,512], index: 1, kind: input, shape index: {}]   ;;  %s1422_s2 = inlined_call_operand.hbm [shape: f32[1,512], index: 2, kind: input, shape index: {}]   ;;  %s1423_s3 = inlined_call_operand.hbm [shape: bf16[64,512], index: 3, kind: output, shape index: {}]  }
   0x1   :  { %9 = vsyncpa [#allocation7], 0 }
   0x2   :  { %11 = vsyncpa [#allocation7 + $0x1], 0 }
   0x3   :  { %12 = vsyncpa [#allocation5], 0 }
   0x4   :  { %14 = vsyncpa [#allocation5 + $0x1], 0  ;;  %s1190_s12 = smov 0   ;;  %s1192_s13 = smov 0  }
   0x5   :  { %s1194_s14 = smov 0   ;;  %s1196_s15 = smov 0  }
   0x6   :  { %s1198_s16 = smov 0   ;;  %s1200_s17 = smov 0  }
   0x7 LB: > { %s35_s18 = sadd.s32 1, %s1151_s16  ;;  %s76_s19 = sadd.s32 1, %s1143_s14  ;;  %s1155_s17 = sphi %s1200_s17, %s20_s17   ;;  %s1151_s16 = sphi %s1198_s16, %s1443_s16   ;;  %s1147_s15 = sphi %s1196_s15, %s1442_s15   ;;  %s1143_s14 = sphi %s1194_s14, %s1441_s14   ;;  %s1139_s13 = sphi %s1192_s13, %s1440_s13   ;;  %s1135_s12 = sphi %s1190_s12, %s1439_s12  }
   0x8   : > { %p37_p0 = scmp.ge.s32.totalorder %s35_s18, 2  ;;  %p83_p1 = scmp.ne.s32.totalorder %s1143_s14, %s1139_s13 }
   0x9   : > { %p84_p2 = scmp.eq.s32.totalorder %s1155_s17, 0  ;;  %p900_p5 = scmp.lt.s32.totalorder %s1155_s17, 2 }
   0xa   : > { %s1445_s18 = smov (%p37_p0, %s35_s18), 0  ;;  %s184_s21 = sand.u32 1, %s1155_s17  }
   0xb   : > { %p85_p4 = por %p84_p2, %p83_p1  ;;  %s72_s20 = ssub.s32 %s1151_s16, %s1445_s18 }
   0xc   : > { %p74_p6 = scmp.eq.s32.totalorder %s72_s20, 0  ;;  %s186_s22 = sand.u32 1, %s1143_s14  }
   0xd   : > { %s847_s23 = sshll.u32 %s1151_s16, 7  ;;  %s803_s25 = sshll.u32 %s186_s22, 7 }
   0xe   : > { %s1238_s24 = scalar_select %p74_p6, %s1143_s14, %s76_s19  }
   0xf   : > { %s197_s28 = scalar_lea.hbm %s1421_s1, %s847_s23  ;;  %p1245_p7 = pnand %p900_p5, %p85_p4 }
  0x10   : > { %s188_s30 = scalar_lea.vmem [#allocation6], %s803_s25  ;;  %s1249_s5 = scalar_lea.sflag [#allocation7], %s184_s21 }
  0x11   : > { %s198_s4 = sshll.u32 %s188_s30, 4  ;;  %p1425_p8 = pneg %p1245_p7  ;;  %s199_s4 = int_to_ptr.vmem [resolvable:$true] %s198_s4 }
  0x12   : > { %s1002_s6 = scalar_lea.vmem %s199_s4, 2048  ;;  %s1157_s7 = smov [#allocation6]  }
  0x13   : > { %p1003_p9 = scmp.ne.s32.totalorder %s199_s4, %s1002_s6  ;;  %s1007_s8 = sshll.u32 %s1157_s7, 4  ;;  %s1008_s8 = int_to_ptr.vmem [resolvable:$false] %s1007_s8 }
  0x14   : > { %s1009_s9 = scalar_lea.vmem %s1008_s8, 4096  ;;  %p1010_p12 = scmp.lt.s32.totalorder %s199_s4, %s1008_s8 }
  0x15   : > { %p1005_p10 = pnand %p1003_p9, %p1425_p8  ;;  %p1011_p13 = scmp.lt.s32.totalorder %s1009_s9, %s1002_s6 }
  0x17   : > { %p1006_p11 = pneg %p1005_p10  ;;  %p1012_p0 = por %p1011_p13, %p1010_p12 }
  0x19   : > { %p1013_p2 = pnand %p1012_p0, %p1006_p11 }
  0x1b   : > { %1016 = shalt.err (!%p1013_p2)
}
  0x1c   : > { %s1158_s10 = smov 256   ;;  %s1159_s11 = smov 128  }
  0x1d   : > { %s1160_s19 = smov 8   ;;  %s1260_s20 = sadd.s32 4294967295, %s1155_s17  }
  0x1e   : > { %891 = dma.hbm_to_vmem [thread:$0]  (!%p1245_p7), %s197_s28, 2048, %s199_s4, %s1249_s5, %s1158_s10, %s1159_s11, %s1160_s19  }
  0x1f   : > { %s799_s21 = sadd.s32 4294967294, %s1155_s17   ;;  %p89_p4 = scmp.ne.s32.totalorder %s1139_s13, %s1135_s12 }
  0x20   : > { %p1424_p5 = scmp.eq.s32.totalorder %s1260_s20, 0  ;;  %p141_p6 = scmp.eq.s32.totalorder %s1260_s20, 1 }
  0x21   : > { %p147_p9 = scmp.eq.s32.totalorder %s799_s21, 1  ;;  %p800_p11 = scmp.ge.s32.totalorder %s1155_s17, 1 }
  0x22   : > { %p1269_p10 = por %p1424_p5, %p89_p4  ;;  %p1277_p12 = por %p141_p6, %p83_p1 }
  0x23   : > { %p1281_p13 = por %p147_p9, %p89_p4  ;;  %p154_p0 = scmp.lt.s32.totalorder %s1155_s17, 3 }
  0x24   : > { %s1429_s25 = scalar_select %p1277_p12, 1, 0 }
  0x25   : > { %s1430_s26 = scalar_select %p1281_p13, 1, 0 }
  0x26   : > { %p1286_p2 = pnand %p800_p11, %p154_p0  ;;  %s1161_s28 = smov [#allocation3]  }
  0x27   : > { %s170_s30 = sshll.u32 %s1161_s28, 4  ;;  %s806_s4 = sshll.u32 %s186_s22, 1  ;;  %s171_s30 = int_to_ptr.vmem [resolvable:$true] %s170_s30 }
  0x28   : > { %p884_p3 = pneg %p1286_p2  ;;  %s848_s6 = sshll.u32 %s1151_s16, 5 }
  0x29   : > { %s1304_s10 = scalar_lea.hbm %s1422_s2, %s848_s6  ;;  %s212_s11 = scalar_lea.vmem [#allocation8], %s806_s4 }
  0x2a   : > { %p1297_p1 = pnand %p884_p3, %p1424_p5  ;;  %s220_s19 = sshll.u32 %s212_s11, 4  ;;  %s221_s19 = int_to_ptr.vmem [resolvable:$true] %s220_s19 }
  0x2b   : > { %s1028_s21 = scalar_lea.vmem %s171_s30, 512  ;;  %p1036_p0 = scmp.lt.s32.totalorder %s171_s30, %s171_s30 }
  0x2c   : > { %p1019_p4 = pneg %p1297_p1  ;;  %p1029_p6 = scmp.ne.s32.totalorder %s171_s30, %s1028_s21 }
  0x2d   : > { %p1037_p3 = scmp.lt.s32.totalorder %s1028_s21, %s1028_s21 }
  0x2e   : > { %p1031_p9 = pnand %p1029_p6, %p1019_p4 }
  0x2f   : > { %p1038_p5 = por %p1037_p3, %p1036_p0 }
  0x30   : > { %p1032_p11 = pneg %p1031_p9 }
  0x32   : > { %p1039_p8 = pnand %p1038_p5, %p1032_p11 }
  0x34   : > { %1042 = shalt.err (!%p1039_p8)
}
  0x35   : > { %s1162_s22 = smov 64   ;;  %s1163_s28 = smov 4  }
  0x36   : > { %887 = dma.hbm_to_vmem [thread:$0]  (!%p1297_p1), %s1420_s0, 512, %s171_s30, [#allocation4], %s1162_s22, %s1162_s22, %s1163_s28  }
  0x37   : > { %s1056_s8 = scalar_lea.vmem %s221_s19, 32  ;;  %p1433_p12 = pneg %p1245_p7 }
  0x38   : > { %p1057_p13 = scmp.ne.s32.totalorder %s221_s19, %s1056_s8  ;;  %s1164_s9 = smov [#allocation8]  }
  0x39   : > { %s1061_s11 = sshll.u32 %s1164_s9, 4  ;;  %s1062_s11 = int_to_ptr.vmem [resolvable:$false] %s1061_s11 }
  0x3a   : > { %p1059_p4 = pnand %p1057_p13, %p1433_p12  ;;  %s1063_s21 = scalar_lea.vmem %s1062_s11, 64 }
  0x3b   : > { %p1064_p8 = scmp.lt.s32.totalorder %s221_s19, %s1062_s11  ;;  %p1065_p5 = scmp.lt.s32.totalorder %s1063_s21, %s1056_s8 }
  0x3c   : > { %p1060_p6 = pneg %p1059_p4 }
  0x3d   : > { %p1066_p9 = por %p1065_p5, %p1064_p8 }
  0x3f   : > { %p1067_p11 = pnand %p1066_p9, %p1060_p6 }
  0x41   : > { %1070 = shalt.err (!%p1067_p11)
}
  0x42   : > { %894 = dma.hbm_to_vmem [thread:$0]  (!%p1245_p7), %s1304_s10, 32, %s221_s19, %s1249_s5  }
  0x43   : > { %229 = sbr.rel (%p1286_p2) target bundleno = 337 (0x151), region = 32  ;;  %p1434_p12 = scmp.eq.s32.totalorder (!%p1286_p2), %s1260_s20, 0 }
  0x48   : > { %1122 = dma.done.wait (%p1434_p12), [#allocation4], 512   ;;  %p1435_p13 = pmov %p1434_p12 }
  0x49   : > { %s235_s30 = sand.u32 1, %s1260_s20   ;;  %s1328_s7 = sand.u32 1, %s1139_s13  }
  0x4a   : > { %1124 = vsyncadd (%p1435_p13), [#allocation4], 4294966784  ;;  %s811_s29 = sshll.u32 %s1328_s7, 7  ;;  %s236_s22 = scalar_lea.sflag [#allocation7], %s235_s30 }
  0x4b   : > { %s1331_s28 = scalar_lea.vmem [#allocation6], %s811_s29 }
  0x4c   : > { %1126 = dma.done.wait (%p1269_p10), %s236_s22, 2080  }
  0x4d   : > { %1128 = vsyncadd (%p1269_p10), %s236_s22, 4294965216  ;;  %v1165_v0 = vmov 0   ;;  %v961_v1 = vld [vmem:[%s1331_s28 + $0x74] ss:$8 sps:$4 sm:$0xff]   ;;  %v963_v2 = vld [vmem:[%s1331_s28 + $0x70] ss:$8 sps:$4 sm:$0xff]   ;;  %v573_v21 = vlaneseq }
  0x4e   : > { %479 = vmatprep.mubr.bf16.mxu0 %v1165_v0  ;;  %499 = vmatprep.mubr.bf16.mxu1 %v1165_v0  ;;  %v964_v3 = vld [vmem:[%s1331_s28 + $0x64] ss:$8 sps:$4 sm:$0xff]   ;;  %v966_v4 = vld [vmem:[%s1331_s28 + $0x60] ss:$8 sps:$4 sm:$0xff]   ;;  %v967_v5 = vld [vmem:[%s1331_s28 + $0x54] ss:$8 sps:$4 sm:$0xff]  }
  0x4f   : > { %447 = vmatprep.subr.bf16.mxu0 %v961_v1  ;;  %858 = vmatprep.subr.bf16.mxu1 %v961_v1  ;;  %v969_v6 = vld [vmem:[%s1331_s28 + $0x50] ss:$8 sps:$4 sm:$0xff]   ;;  %v970_v7 = vld [vmem:[%s1331_s28 + $0x44] ss:$8 sps:$4 sm:$0xff]   ;;  %v972_v8 = vld [vmem:[%s1331_s28 + $0x40] ss:$8 sps:$4 sm:$0xff]  }
  0x50   : > { %448 = vmatpush1.bf16.msra.mxu0 %v963_v2  ;;  %866 = vmatpush1.bf16.msra.mxu1 %v963_v2  ;;  %v973_v9 = vld [vmem:[%s1331_s28 + $0x34] ss:$8 sps:$4 sm:$0xff]   ;;  %v975_v10 = vld [vmem:[%s1331_s28 + $0x30] ss:$8 sps:$4 sm:$0xff]   ;;  %v976_v11 = vld [vmem:[%s1331_s28 + $0x24] ss:$8 sps:$4 sm:$0xff]  }
  0x51   : > { %449 = vmatprep.subr.bf16.mxu0 %v964_v3  ;;  %859 = vmatprep.subr.bf16.mxu1 %v964_v3  ;;  %v978_v12 = vld [vmem:[%s1331_s28 + $0x20] ss:$8 sps:$4 sm:$0xff]   ;;  %v979_v13 = vld [vmem:[%s1331_s28 + $0x14] ss:$8 sps:$4 sm:$0xff]   ;;  %v981_v14 = vld [vmem:[%s1331_s28 + $0x10] ss:$8 sps:$4 sm:$0xff]  }
  0x52   : > { %v982_v15 = vld [vmem:[%s1331_s28 + $0x4] ss:$8 sps:$4 sm:$0xff]   ;;  %v984_v16 = vld [vmem:[%s1331_s28] ss:$8 sps:$4 sm:$0xff]   ;;  %v986_v18 = vld [vmem:[#allocation3 + $0x10] sm:$0xff]   ;;  %s812_s5 = sshll.u32 %s1328_s7, 1 }
  0x53   : > { %v985_v17 = vld [vmem:[#allocation3] sm:$0xff]   ;;  %v987_v19 = vld [vmem:[#allocation3 + $0x8] sm:$0xff]   ;;  %v988_v20 = vld [vmem:[#allocation3 + $0x18] sm:$0xff]   ;;  %v574_v22 = vshrl.u32 %v573_v21, 7  ;;  %s248_s20 = scalar_lea.vmem [#allocation8], %s812_s5  ;;  %s813_s23 = sshll.u32 %s1328_s7, 6 }
  0x54   : > { %450 = vmatpush1.bf16.msra.mxu0 %v966_v4  ;;  %867 = vmatpush1.bf16.msra.mxu1 %v966_v4  ;;  %v571_v25 = vld [vmem:[%s248_s20] sm:$0x3]  ;;  %s1355_s27 = scalar_lea.vmem [#allocation9], %s813_s23  ;;  %s857_s19 = sshll.u32 %s1147_s15, 7 }
  0x55   : > { %451 = vmatprep.subr.bf16.mxu0 %v967_v5  ;;  %860 = vmatprep.subr.bf16.mxu1 %v967_v5  ;;  %v575_v23 = vsub.s32 0, %v574_v22  ;;  %v579_v24 = vsub.s32 1, %v574_v22  ;;  %s672_s10 = sshll.u32 %s1355_s27, 4  ;;  %s1370_s8 = scalar_lea.hbm %s1423_s3, %s857_s19  ;;  %s1363_s10 = int_to_ptr.vmem [resolvable:$true] %s672_s10 }
  0x56   : > { %s656_s15 = scalar_lea.sflag [#allocation5], %s1328_s7  ;;  %s1071_s9 = scalar_lea.vmem %s1363_s10, 1024 }
  0x57   : > { %v576_v26 = vrot.slane %v571_v25, %v575_v23  ;;  %v580_v27 = vrot.slane %v571_v25, %v579_v24  ;;  %p1072_p7 = scmp.ne.s32.totalorder %s1363_s10, %s1071_s9  ;;  %p1436_p10 = scmp.ne.s32.totalorder %s1429_s25, 0 }
  0x58   : > { %452 = vmatpush1.bf16.msra.mxu0 %v969_v6  ;;  %868 = vmatpush1.bf16.msra.mxu1 %v969_v6  ;;  %s1166_s11 = smov [#allocation9]  }
  0x59   : > { %453 = vmatprep.subr.bf16.mxu0 %v970_v7  ;;  %861 = vmatprep.subr.bf16.mxu1 %v970_v7  ;;  %p1073_p2 = pnand %p1072_p7, %p1436_p10  ;;  %s1075_s21 = sshll.u32 %s1166_s11, 4  ;;  %s1076_s21 = int_to_ptr.vmem [resolvable:$false] %s1075_s21 }
  0x5a   : > { %s1077_s30 = scalar_lea.vmem %s1076_s21, 2048  ;;  %p1078_p0 = scmp.lt.s32.totalorder %s1363_s10, %s1076_s21 }
  0x5b   : > { %p1074_p1 = pneg %p1073_p2  ;;  %p1079_p3 = scmp.lt.s32.totalorder %s1077_s30, %s1071_s9 }
  0x5c   : > { %454 = vmatpush1.bf16.msra.mxu0 %v972_v8  ;;  %869 = vmatpush1.bf16.msra.mxu1 %v972_v8 }
  0x5d   : > { %455 = vmatprep.subr.bf16.mxu0 %v973_v9  ;;  %862 = vmatprep.subr.bf16.mxu1 %v973_v9  ;;  %p1080_p4 = por %p1079_p3, %p1078_p0 }
  0x5f   : > { %p1081_p6 = pnand %p1080_p4, %p1074_p1 }
  0x60   : > { %456 = vmatpush1.bf16.msra.mxu0 %v975_v10  ;;  %870 = vmatpush1.bf16.msra.mxu1 %v975_v10 }
  0x61   : > { %457 = vmatprep.subr.bf16.mxu0 %v976_v11  ;;  %863 = vmatprep.subr.bf16.mxu1 %v976_v11 }
  0x64   : > { %458 = vmatpush1.bf16.msra.mxu0 %v978_v12  ;;  %871 = vmatpush1.bf16.msra.mxu1 %v978_v12 }
  0x65   : > { %459 = vmatprep.subr.bf16.mxu0 %v979_v13  ;;  %864 = vmatprep.subr.bf16.mxu1 %v979_v13 }
  0x68   : > { %460 = vmatpush1.bf16.msra.mxu0 %v981_v14  ;;  %872 = vmatpush1.bf16.msra.mxu1 %v981_v14 }
  0x69   : > { %461 = vmatprep.subr.bf16.mxu0 %v982_v15  ;;  %865 = vmatprep.subr.bf16.mxu1 %v982_v15 }
  0x6c   : > { %462 = vmatpush1.bf16.msra.mxu0 %v984_v16  ;;  %873 = vmatpush1.bf16.msra.mxu1 %v984_v16 }
  0x6f   : > { %480 = vmatmul.mubr.bf16.vlgmr.msra.gmra.mxu0 %v985_v17  ;;  %500 = vmatmul.mubr.bf16.vlgmr.msra.gmra.mxu1 %v986_v18 }
  0x70   : > { %489 = vmatprep.mubr.bf16.mxu0 %v1165_v0  ;;  %509 = vmatprep.mubr.bf16.mxu1 %v1165_v0 }
  0x77   : > { %490 = vmatmul.mubr.bf16.gmra.mxu0 %v987_v19  ;;  %510 = vmatmul.mubr.bf16.gmra.mxu1 %v988_v20 }
 0x12f   : > { %v481_v28 = vpop.f32.mrf.mxu0  ;;  %v501_v29 = vpop.f32.mrf.mxu1 }
 0x130   : > { %v583_v32 = vadd.f32 %v576_v26, %v481_v28  ;;  %v591_v33 = vadd.f32 %v576_v26, %v501_v29 }
 0x131   : > { %v483_v30 = vpop.f32.mrf.mxu0  ;;  %v503_v31 = vpop.f32.mrf.mxu1 }
 0x132   : > { %v584_v34 = vadd.f32 %v580_v27, %v483_v30  ;;  %v592_v35 = vadd.f32 %v580_v27, %v503_v31 }
 0x133   : > { %v485_v36 = vpop.f32.mrf.mxu0  ;;  %v505_v37 = vpop.f32.mrf.mxu1 }
 0x134   : > { %v849_v38 = vpack.c.bf16 %v584_v34, %v583_v32  ;;  %v853_v39 = vpack.c.bf16 %v592_v35, %v591_v33  ;;  %v585_v42 = vadd.f32 %v576_v26, %v485_v36  ;;  %v593_v43 = vadd.f32 %v576_v26, %v505_v37 }
 0x135   : > { %v487_v40 = vpop.f32.mrf.mxu0  ;;  %v507_v41 = vpop.f32.mrf.mxu1 }
 0x136   : > { %647 = vst [vmem:[%s1355_s27] sm:$0xff] %v849_v38  ;;  %651 = vst [vmem:[%s1355_s27 + $0x20] sm:$0xff] %v853_v39  ;;  %v586_v44 = vadd.f32 %v580_v27, %v487_v40  ;;  %v594_v45 = vadd.f32 %v580_v27, %v507_v41 }
 0x137   : > { %v491_v46 = vpop.f32.mrf.mxu0  ;;  %v511_v47 = vpop.f32.mrf.mxu1 }
 0x138   : > { %v850_v48 = vpack.c.bf16 %v586_v44, %v585_v42  ;;  %v854_v49 = vpack.c.bf16 %v594_v45, %v593_v43  ;;  %v587_v52 = vadd.f32 %v576_v26, %v491_v46  ;;  %v595_v53 = vadd.f32 %v576_v26, %v511_v47 }
 0x139   : > { %v493_v50 = vpop.f32.mrf.mxu0  ;;  %v513_v51 = vpop.f32.mrf.mxu1 }
 0x13a   : > { %648 = vst [vmem:[%s1355_s27 + $0x8] sm:$0xff] %v850_v48  ;;  %652 = vst [vmem:[%s1355_s27 + $0x28] sm:$0xff] %v854_v49  ;;  %v588_v54 = vadd.f32 %v580_v27, %v493_v50  ;;  %v596_v55 = vadd.f32 %v580_v27, %v513_v51 }
 0x13b   : > { %v495_v56 = vpop.f32.mrf.mxu0  ;;  %v515_v57 = vpop.f32.mrf.mxu1 }
 0x13c   : > { %v851_v58 = vpack.c.bf16 %v588_v54, %v587_v52  ;;  %v855_v59 = vpack.c.bf16 %v596_v55, %v595_v53  ;;  %v589_v62 = vadd.f32 %v576_v26, %v495_v56  ;;  %v597_v63 = vadd.f32 %v576_v26, %v515_v57 }
 0x13d   : > { %v497_v60 = vpop.f32.mrf.mxu0  ;;  %v517_v61 = vpop.f32.mrf.mxu1 }
 0x13e   : > { %649 = vst [vmem:[%s1355_s27 + $0x10] sm:$0xff] %v851_v58  ;;  %653 = vst [vmem:[%s1355_s27 + $0x30] sm:$0xff] %v855_v59  ;;  %v590_v0 = vadd.f32 %v580_v27, %v497_v60  ;;  %v598_v1 = vadd.f32 %v580_v27, %v517_v61 }
 0x140   : > { %v852_v2 = vpack.c.bf16 %v590_v0, %v589_v62  ;;  %v856_v3 = vpack.c.bf16 %v598_v1, %v597_v63 }
 0x142   : > { %650 = vst [vmem:[%s1355_s27 + $0x18] sm:$0xff] %v852_v2  ;;  %654 = vst [vmem:[%s1355_s27 + $0x38] sm:$0xff] %v856_v3 }
 0x143   : > { %1084 = shalt.err (!%p1081_p6)
}
 0x144   : > { %s1085_s29 = scalar_lea.hbm %s1370_s8, 1024  ;;  %s1089_s5 = scalar_lea.hbm %s1423_s3, 2048 }
 0x145   : > { %p1086_p8 = scmp.ne.s32.totalorder %s1370_s8, %s1085_s29  ;;  %p1090_p11 = scmp.lt.s32.totalorder %s1370_s8, %s1423_s3 }
 0x146   : > { %p1091_p12 = scmp.lt.s32.totalorder %s1089_s5, %s1085_s29 }
 0x147   : > { %p1087_p5 = pnand %p1086_p8, %p1436_p10 }
 0x148   : > { %p1092_p13 = por %p1091_p12, %p1090_p11 }
 0x149   : > { %p1088_p9 = pneg %p1087_p5 }
 0x14b   : > { %p1093_p7 = pnand %p1092_p13, %p1088_p9 }
 0x14d   : > { %1096 = shalt.err (!%p1093_p7)
}
 0x14e   : > { %s1167_s27 = smov 128   ;;  %s1168_s19 = smov 256  }
 0x14f   : > { %s1169_s6 = smov 8  }
 0x150   : > { %882 = dma.vmem_to_hbm [thread:$0]  (%p1436_p10), %s1363_s10, 1024, %s1370_s8, %s656_s15, %s1167_s27, %s1168_s19, %s1169_s6  }
 0x151 PF: > { %s687_s4 = sand.u32 1, %s1135_s12   ;;  %p1437_p2 = scmp.ne.s32.totalorder %s1430_s26, 0 }
 0x152   : > { %p1438_p1 = scmp.ge.s32.totalorder %s1155_s17, 2  ;;  %s688_s9 = scalar_lea.sflag [#allocation5], %s687_s4 }
 0x154   : > { %p896_p0 = pnand %p1438_p1, %p1437_p2 }
 0x156   : > { %p897_p3 = pneg %p896_p0 }
 0x158   : > { %1130 = dma.done.wait (%p897_p3), %s688_s9, 1024  }
 0x159   : > { %1132 = vsyncadd (%p897_p3), %s688_s9, 4294966272  ;;  %s20_s17 = sadd.s32 1, %s1155_s17   ;;  %s1439_s12 = smov %s1139_s13 }
 0x15a   : > { %p17_p4 = scmp.ge.s32.totalorder %s20_s17, 4   ;;  %s1440_s13 = smov %s1143_s14 }
 0x15b   : > { %s1441_s14 = smov %s1238_s24  ;;  %s1442_s15 = smov %s1151_s16 }
 0x15c   : > { %s1443_s16 = smov %s1445_s18  ;;  %19 = sbr.rel (!%p17_p4) target bundleno = 7 (0x7), region = 102 }
 0x161   :  { %693 = vsyncpa [#allocation4], 1 }
 0x162   :  { %695 = vsyncpa [#allocation4 + $0x1], 1 }
 0x163   :  { %696 = vsyncpa [#allocation7], 1 }
 0x164   :  { %698 = vsyncpa [#allocation7 + $0x1], 1 }
 0x165   :  { %699 = vsyncpa [#allocation5], 1 }
 0x166   :  { %701 = vsyncpa [#allocation5 + $0x1], 1 }

</bundles_post_ra>
